<compile_context>
chip_gen: v6e
topology: v6e:2x2x1
jax: 0.10.0
libtpu: 0.0.40
codegen_flags: <defaults>
</compile_context>

<pallas_src>
import functools
import math

import jax
import jax.numpy as jnp
from jax import lax
from jax.experimental import pallas as pl
from jax.experimental.pallas import tpu as pltpu


def _round_up(x, m):
    return ((x + m - 1) // m) * m


def _supcon_tile_kernel(q_ref, k_ref, qlab_ref, klab_ref, out_ref,
                        m_sc, l_sc, sml_sc, sm_sc, *,
                        temp_ratio, n_real, tq, tk, has_pad):
    i = pl.program_id(0)   # anchor-row tile (parallel)
    kk = pl.program_id(1)  # contrast-column tile (reduction axis, runs last)

    # ---- init per-row online-softmax state at the first column tile ----
    @pl.when(kk == 0)
    def _():
        m_sc[...] = jnp.full_like(m_sc, -1e30)
        l_sc[...] = jnp.zeros_like(l_sc)
        sml_sc[...] = jnp.zeros_like(sml_sc)
        sm_sc[...] = jnp.zeros_like(sm_sc)

    # ---- similarity tile on the MXU (inputs pre-normalized / pre-scaled by 1/T
    #      in the wrapper; bf16 in, f32 accumulation) ----
    sim = lax.dot_general(q_ref[...], k_ref[...],
                          dimension_numbers=(((1,), (1,)), ((), ())),
                          preferred_element_type=jnp.float32)       # (TQ, TK) f32

    # ---- online logsumexp over column tiles ----
    # NOTE: the max deliberately includes the self column and any padded (zero)
    # columns: logsumexp is shift-invariant and those columns are excluded from
    # `l` below, so this only changes the stabilizer m.  Do NOT "optimize" the
    # keep mask into this max.
    m_old = m_sc[...]
    m_new = jnp.maximum(m_old, jnp.max(sim, axis=1, keepdims=True))
    alpha = jnp.exp(m_old - m_new)
    m_sc[...] = m_new

    qlab = qlab_ref[...]   # (TQ, 1) int32
    klab = klab_ref[...]   # (1, TK) int32

    # Tiles that need the self-contrast / padded-column mask: those intersecting
    # the diagonal, plus (only when padding exists) tiles containing padded cols.
    diag = jnp.logical_and(i * tq < (kk + 1) * tk, kk * tk < (i + 1) * tq)
    if has_pad:  # Python-static: drops out entirely when N is tile-aligned
        special = jnp.logical_or(diag, (kk + 1) * tk > n_real)
    else:
        special = diag

    @pl.when(special)
    def _():
        row_ids = i * tq + lax.broadcasted_iota(jnp.int32, (tq, 1), 0)
        col_ids = kk * tk + lax.broadcasted_iota(jnp.int32, (1, tk), 1)
        keep = jnp.logical_and(row_ids != col_ids, col_ids < n_real)
        pos = jnp.logical_and(qlab == klab, keep)
        p = jnp.where(keep, jnp.exp(sim - m_new), 0.0)
        l_sc[...] = alpha * l_sc[...] + jnp.sum(p, axis=1, keepdims=True)
        sml_sc[...] += jnp.sum(jnp.where(pos, sim, 0.0), axis=1, keepdims=True)
        sm_sc[...] += jnp.sum(pos.astype(jnp.float32), axis=1, keepdims=True)

    @pl.when(jnp.logical_not(special))
    def _():
        # Fast path (vast majority of tiles): no iota / compare / and / extra select.
        pos = qlab == klab
        p = jnp.exp(sim - m_new)
        l_sc[...] = alpha * l_sc[...] + jnp.sum(p, axis=1, keepdims=True)
        sml_sc[...] += jnp.sum(jnp.where(pos, sim, 0.0), axis=1, keepdims=True)
        sm_sc[...] += jnp.sum(pos.astype(jnp.float32), axis=1, keepdims=True)

    # ---- finalize this row tile on the last column tile ----
    @pl.when(kk == pl.num_programs(1) - 1)
    def _():
        s_m = sm_sc[...]
        # sum(mask*log_prob) = sum(mask*sim) - sum(mask)*(row_max + log(denominator))
        # Rows with zero positives (e.g. labels=None) give 0 via the eps, matching the
        # eps'd reference formula.  Divide goes to the EUP slot via approx reciprocal.
        mean_log_prob_pos = (
            sml_sc[...] - s_m * (m_sc[...] + jnp.log(l_sc[...]))
        ) * pl.reciprocal(s_m + 1e-12, approx=True)
        out_ref[...] = (-temp_ratio) * mean_log_prob_pos


def supcon_loss(features, labels=None, temperature=0.07, base_temperature=0.07,
                block_q=512, block_k=256, mxu_dtype=jnp.bfloat16,
                contrast_buffers=2):
    """JAX wrapper reproducing SupConLoss.forward semantics.

    block_q / block_k: anchor-row / contrast-column tile sizes.  Defaults (512, 256)
    target v6e/v7x (256-wide MXU, bf16 inputs); on v5e prefer block_k=128.  Blocks are
    clamped automatically for small N.  contrast_buffers>2 enables deeper
    multibuffering of the contrast stream (useful if the k-tile DMA is exposed).
    """
    features = jnp.asarray(features, jnp.float32)
    if features.ndim < 3:
        features = features[:, None, :]
    if features.shape[1] > features.shape[2]:
        features = jnp.transpose(features, (0, 2, 1))
    b, v, d = features.shape
    n = b * v

    # contrast_features = torch.cat(torch.unbind(features, 1), 0) -> view-major [N, D]
    contrast = jnp.transpose(features, (1, 0, 2)).reshape(n, d)

    # ---- hoisted out of the kernel: L2-normalize once, fold 1/temperature into the
    #      anchor copy, cast both to the MXU dtype (halves k-tile DMA bytes). ----
    norm = jnp.sqrt(jnp.sum(contrast * contrast, axis=-1, keepdims=True))
    contrast = contrast / jnp.maximum(norm, 1e-12)          # == F.normalize(eps=1e-12)
    anchors = (contrast * (1.0 / float(temperature))).astype(mxu_dtype)
    contrast = contrast.astype(mxu_dtype)

    if labels is not None:
        # labels.repeat(1, n_views).flatten() on a 1-D tensor == tile(labels, n_views)
        lab = jnp.tile(jnp.asarray(labels).reshape(-1).astype(jnp.int32), v)
    else:
        # mask = eye(N)  <=>  every row has a unique label
        lab = jnp.arange(n, dtype=jnp.int32)

    # ---- tile sizing: clamp for small N; keep (8, 128) alignment ----
    block_q = _round_up(max(8, min(block_q, _round_up(n, 8))), 8)
    block_k = _round_up(max(128, min(block_k, _round_up(n, 128))), 128)

    # Pad N up to a common tile multiple.  Padded columns are excluded in-kernel via
    # the n_real bound on the special tiles; padded rows are dropped from the final
    # mean below.  Pad label is -1 so it never collides with a real class.
    blk = math.lcm(block_q, block_k)
    n_pad = _round_up(n, blk)
    pad = n_pad - n
    anchors_p = jnp.pad(anchors, ((0, pad), (0, 0)))
    contrast_p = jnp.pad(contrast, ((0, pad), (0, 0)))
    lab_p = jnp.pad(lab, (0, pad), constant_values=-1)
    lab_rows = lab_p.reshape(n_pad, 1)
    lab_cols = lab_p.reshape(1, n_pad)

    kernel = functools.partial(
        _supcon_tile_kernel,
        temp_ratio=float(temperature) / float(base_temperature),
        n_real=n, tq=block_q, tk=block_k, has_pad=(pad > 0))

    # Contrast-column stream: optionally deepen multibuffering if DMA is exposed.
    k_spec_kwargs = {}
    if contrast_buffers and contrast_buffers != 2:
        k_spec_kwargs["pipeline_mode"] = pl.Buffered(int(contrast_buffers))
    contrast_spec = pl.BlockSpec((block_k, d), lambda i, k: (k, 0), **k_spec_kwargs)

    per_row = pl.pallas_call(
        kernel,
        out_shape=jax.ShapeDtypeStruct((n_pad, 1), jnp.float32),
        grid_spec=pltpu.PrefetchScalarGridSpec(
            num_scalar_prefetch=0,
            grid=(n_pad // block_q, n_pad // block_k),
            in_specs=[
                pl.BlockSpec((block_q, d), lambda i, k: (i, 0)),   # anchors (resident over k)
                contrast_spec,                                     # contrast columns (streamed)
                pl.BlockSpec((block_q, 1), lambda i, k: (i, 0)),   # row labels
                pl.BlockSpec((1, block_k), lambda i, k: (0, k)),   # col labels
            ],
            out_specs=pl.BlockSpec((block_q, 1), lambda i, k: (i, 0)),
            scratch_shapes=[pltpu.VMEM((block_q, 1), jnp.float32)] * 4,
        ),
        # Raise vmem_limit_bytes here if using 512-row anchor tiles with very large D.
        compiler_params=pltpu.CompilerParams(
            dimension_semantics=("parallel", "arbitrary")),
    )(anchors_p, contrast_p, lab_rows, lab_cols)

    # loss.mean() over the real rows only
    return jnp.sum(per_row[:n, 0]) / n


def _supcon_loss_ref(features, labels, temperature=0.07, base_temperature=0.07):
    """Pure-JAX f32 reference mirroring the PyTorch forward (correctness check)."""
    features = jnp.asarray(features, jnp.float32)
    if features.ndim < 3:
        features = features[:, None, :]
    if features.shape[1] > features.shape[2]:
        features = jnp.transpose(features, (0, 2, 1))
    b, v, d = features.shape
    n = b * v
    norm = jnp.sqrt(jnp.sum(features * features, axis=-1, keepdims=True))
    features = features / jnp.maximum(norm, 1e-12)
    c = jnp.transpose(features, (1, 0, 2)).reshape(n, d)
    if labels is not None:
        lab = jnp.tile(jnp.asarray(labels).reshape(-1), v)
        mask = (lab[:, None] == lab[None, :]).astype(jnp.float32)
    else:
        mask = jnp.eye(n, dtype=jnp.float32)
    sim = (c @ c.T) / temperature
    logits = sim - jnp.max(sim, axis=1, keepdims=True)
    logits_mask = 1.0 - jnp.eye(n, dtype=jnp.float32)
    mask = mask * logits_mask
    exp_logits = jnp.exp(logits) * logits_mask
    log_prob = logits - jnp.log(jnp.sum(exp_logits, axis=1, keepdims=True))
    mean_log_prob_pos = jnp.sum(mask * log_prob, axis=1) / (jnp.sum(mask, axis=1) + 1e-12)
    loss = -(temperature / base_temperature) * mean_log_prob_pos
    return jnp.mean(loss)


if __name__ == "__main__":
    key = jax.random.PRNGKey(0)
    k_feat, k_lab = jax.random.split(key)

    batch, n_views, feat_dim = 8, 2, 32
    features = jax.random.normal(k_feat, (batch, n_views, feat_dim), dtype=jnp.float32)
    labels = jax.random.randint(k_lab, (batch,), 0, 4, dtype=jnp.int32)

    loss = supcon_loss(features, labels, temperature=0.07, base_temperature=0.07)
    loss = jax.block_until_ready(loss)

    ref = _supcon_loss_ref(features, labels, temperature=0.07, base_temperature=0.07)
    # Tolerance loosened slightly because the MXU inputs are bf16 (f32 accumulation).
    assert jnp.allclose(loss, ref, rtol=2e-2, atol=2e-2), (loss, ref)

    print("KERNEL_OK")
</pallas_src>

<mosaic_0001>
module attributes {stable_mosaic.version = 11 : i64} {
  func.func @_supcon_tile_kernel(%arg0: i32, %arg1: i32, %arg2: memref<16x32xbf16, #tpu.memory_space<vmem>>, %arg3: memref<128x32xbf16, #tpu.memory_space<vmem>>, %arg4: memref<16x1xi32, #tpu.memory_space<vmem>>, %arg5: memref<1x128xi32, #tpu.memory_space<vmem>>, %arg6: memref<16x1xf32, #tpu.memory_space<vmem>>, %arg7: memref<16x1xf32, #tpu.memory_space<vmem>>, %arg8: memref<16x1xf32, #tpu.memory_space<vmem>>, %arg9: memref<16x1xf32, #tpu.memory_space<vmem>>, %arg10: memref<16x1xf32, #tpu.memory_space<vmem>>) attributes {dimension_semantics = [#tpu.dimension_semantics<parallel>, #tpu.dimension_semantics<arbitrary>], iteration_bounds = array<i64: 8, 1>, scalar_prefetch = 0 : i64, scratch_operands = 4 : i64, tpu.core_type = #tpu.core_type<tc>, window_params = [{transform_indices = @transform_0, window_bounds = array<i64: 16, 32>}, {transform_indices = @transform_1, window_bounds = array<i64: 128, 32>}, {transform_indices = @transform_2, window_bounds = array<i64: 16, 1>}, {transform_indices = @transform_3, window_bounds = array<i64: 1, 128>}, {transform_indices = @transform_4, window_bounds = array<i64: 16, 1>}]} {
    %c0_i32 = arith.constant 0 : i32
    %0 = arith.cmpi eq, %arg1, %c0_i32 : i32
    %1 = arith.extui %0 : i1 to i32
    %c0_i32_0 = arith.constant 0 : i32
    %2 = arith.cmpi ne, %1, %c0_i32_0 : i32
    scf.if %2 {
      %cst_23 = arith.constant -1.000000e+30 : f32
      %36 = vector.broadcast %cst_23 : f32 to vector<16x1xf32>
      %c0_24 = arith.constant 0 : index
      %c0_25 = arith.constant 0 : index
      %37 = vector.load %arg7[%c0_24, %c0_25] : memref<16x1xf32, #tpu.memory_space<vmem>>, vector<16x1xf32>
      tpu.vector_store %arg7[%c0_24, %c0_25], %36 {strides = array<i32>} : memref<16x1xf32, #tpu.memory_space<vmem>>, vector<16x1xf32>,
      %cst_26 = arith.constant 0.000000e+00 : f32
      %38 = vector.broadcast %cst_26 : f32 to vector<16x1xf32>
      %c0_27 = arith.constant 0 : index
      %c0_28 = arith.constant 0 : index
      %39 = vector.load %arg8[%c0_27, %c0_28] : memref<16x1xf32, #tpu.memory_space<vmem>>, vector<16x1xf32>
      tpu.vector_store %arg8[%c0_27, %c0_28], %38 {strides = array<i32>} : memref<16x1xf32, #tpu.memory_space<vmem>>, vector<16x1xf32>,
      %cst_29 = arith.constant 0.000000e+00 : f32
      %40 = vector.broadcast %cst_29 : f32 to vector<16x1xf32>
      %c0_30 = arith.constant 0 : index
      %c0_31 = arith.constant 0 : index
      %41 = vector.load %arg9[%c0_30, %c0_31] : memref<16x1xf32, #tpu.memory_space<vmem>>, vector<16x1xf32>
      tpu.vector_store %arg9[%c0_30, %c0_31], %40 {strides = array<i32>} : memref<16x1xf32, #tpu.memory_space<vmem>>, vector<16x1xf32>,
      %cst_32 = arith.constant 0.000000e+00 : f32
      %42 = vector.broadcast %cst_32 : f32 to vector<16x1xf32>
      %c0_33 = arith.constant 0 : index
      %c0_34 = arith.constant 0 : index
      %43 = vector.load %arg10[%c0_33, %c0_34] : memref<16x1xf32, #tpu.memory_space<vmem>>, vector<16x1xf32>
      tpu.vector_store %arg10[%c0_33, %c0_34], %42 {strides = array<i32>} : memref<16x1xf32, #tpu.memory_space<vmem>>, vector<16x1xf32>,
    } else {
    }
    %c0 = arith.constant 0 : index
    %c0_1 = arith.constant 0 : index
    %3 = vector.load %arg2[%c0, %c0_1] : memref<16x32xbf16, #tpu.memory_space<vmem>>, vector<16x32xbf16>
    %c0_2 = arith.constant 0 : index
    %c0_3 = arith.constant 0 : index
    %4 = vector.load %arg3[%c0_2, %c0_3] : memref<128x32xbf16, #tpu.memory_space<vmem>>, vector<128x32xbf16>
    %cst = arith.constant dense<0.000000e+00> : vector<16x128xf32>
    %5 = tpu.matmul %3, %4, %cst {dimension_numbers = #tpu.dot_dimension_numbers<[1], [1], [0], [0], [0, 0, 1, 0], [], []>} : vector<16x32xbf16>, vector<128x32xbf16>, vector<16x128xf32> -> vector<16x128xf32>
    %c0_4 = arith.constant 0 : index
    %c0_5 = arith.constant 0 : index
    %6 = vector.load %arg7[%c0_4, %c0_5] : memref<16x1xf32, #tpu.memory_space<vmem>>, vector<16x1xf32>
    %cst_6 = arith.constant dense<0xFF800000> : vector<16xf32>
    %7 = vector.multi_reduction <maximumf>, %5, %cst_6 [1] : vector<16x128xf32> to vector<16xf32>
    %8 = vector.shape_cast %7 : vector<16xf32> to vector<16x1xf32>
    %9 = arith.maximumf %6, %8 : vector<16x1xf32>
    %10 = arith.subf %6, %9 : vector<16x1xf32>
    %11 = math.exp %10 : vector<16x1xf32>
    %c0_7 = arith.constant 0 : index
    %c0_8 = arith.constant 0 : index
    %12 = vector.load %arg7[%c0_7, %c0_8] : memref<16x1xf32, #tpu.memory_space<vmem>>, vector<16x1xf32>
    tpu.vector_store %arg7[%c0_7, %c0_8], %9 {strides = array<i32>} : memref<16x1xf32, #tpu.memory_space<vmem>>, vector<16x1xf32>,
    %c0_9 = arith.constant 0 : index
    %c0_10 = arith.constant 0 : index
    %13 = vector.load %arg4[%c0_9, %c0_10] : memref<16x1xi32, #tpu.memory_space<vmem>>, vector<16x1xi32>
    %c0_11 = arith.constant 0 : index
    %c0_12 = arith.constant 0 : index
    %14 = vector.load %arg5[%c0_11, %c0_12] : memref<1x128xi32, #tpu.memory_space<vmem>>, vector<1x128xi32>
    %c16_i32 = arith.constant 16 : i32
    %15 = arith.muli %arg0, %c16_i32 : i32
    %c1_i32 = arith.constant 1 : i32
    %16 = arith.addi %arg1, %c1_i32 : i32
    %c128_i32 = arith.constant 128 : i32
    %17 = arith.muli %16, %c128_i32 : i32
    %18 = arith.cmpi slt, %15, %17 : i32
    %c128_i32_13 = arith.constant 128 : i32
    %19 = arith.muli %arg1, %c128_i32_13 : i32
    %c1_i32_14 = arith.constant 1 : i32
    %20 = arith.addi %arg0, %c1_i32_14 : i32
    %c16_i32_15 = arith.constant 16 : i32
    %21 = arith.muli %20, %c16_i32_15 : i32
    %22 = arith.cmpi slt, %19, %21 : i32
    %23 = arith.andi %18, %22 : i1
    %c1_i32_16 = arith.constant 1 : i32
    %24 = arith.addi %arg1, %c1_i32_16 : i32
    %c128_i32_17 = arith.constant 128 : i32
    %25 = arith.muli %24, %c128_i32_17 : i32
    %c16_i32_18 = arith.constant 16 : i32
    %26 = arith.cmpi sgt, %25, %c16_i32_18 : i32
    %27 = arith.ori %23, %26 : i1
    %28 = arith.extui %27 : i1 to i32
    %c0_i32_19 = arith.constant 0 : i32
    %29 = arith.cmpi ne, %28, %c0_i32_19 : i32
    scf.if %29 {
      %c16_i32_23 = arith.constant 16 : i32
      %36 = arith.muli %arg0, %c16_i32_23 : i32
      %37 = tpu.iota {dimensions = array<i32: 0>} : vector<16x1xi32>
      %38 = vector.broadcast %36 : i32 to vector<16x1xi32>
      %39 = arith.addi %38, %37 : vector<16x1xi32>
      %c128_i32_24 = arith.constant 128 : i32
      %40 = arith.muli %arg1, %c128_i32_24 : i32
      %41 = tpu.iota {dimensions = array<i32: 1>} : vector<1x128xi32>
      %42 = vector.broadcast %40 : i32 to vector<1x128xi32>
      %43 = arith.addi %42, %41 : vector<1x128xi32>
      %44 = vector.broadcast %39 : vector<16x1xi32> to vector<16x128xi32>
      %45 = vector.broadcast %43 : vector<1x128xi32> to vector<16x128xi32>
      %46 = arith.cmpi ne, %44, %45 : vector<16x128xi32>
      %c16_i32_25 = arith.constant 16 : i32
      %47 = vector.broadcast %c16_i32_25 : i32 to vector<1x128xi32>
      %48 = arith.cmpi slt, %43, %47 : vector<1x128xi32>
      %49 = vector.broadcast %48 : vector<1x128xi1> to vector<16x128xi1>
      %50 = arith.andi %46, %49 : vector<16x128xi1>
      %51 = vector.broadcast %13 : vector<16x1xi32> to vector<16x128xi32>
      %52 = vector.broadcast %14 : vector<1x128xi32> to vector<16x128xi32>
      %53 = arith.cmpi eq, %51, %52 : vector<16x128xi32>
      %54 = arith.andi %53, %50 : vector<16x128xi1>
      %55 = vector.broadcast %9 : vector<16x1xf32> to vector<16x128xf32>
      %56 = arith.subf %5, %55 : vector<16x128xf32>
      %57 = math.exp %56 : vector<16x128xf32>
      %cst_26 = arith.constant 0.000000e+00 : f32
      %58 = vector.broadcast %cst_26 : f32 to vector<16x128xf32>
      %59 = arith.select %50, %57, %58 : vector<16x128xi1>, vector<16x128xf32>
      %c0_27 = arith.constant 0 : index
      %c0_28 = arith.constant 0 : index
      %60 = vector.load %arg8[%c0_27, %c0_28] : memref<16x1xf32, #tpu.memory_space<vmem>>, vector<16x1xf32>
      %61 = arith.mulf %11, %60 : vector<16x1xf32>
      %cst_29 = arith.constant dense<0.000000e+00> : vector<16xf32>
      %62 = vector.multi_reduction <add>, %59, %cst_29 [1] : vector<16x128xf32> to vector<16xf32>
      %63 = vector.shape_cast %62 : vector<16xf32> to vector<16x1xf32>
      %64 = arith.addf %61, %63 : vector<16x1xf32>
      %c0_30 = arith.constant 0 : index
      %c0_31 = arith.constant 0 : index
      %65 = vector.load %arg8[%c0_30, %c0_31] : memref<16x1xf32, #tpu.memory_space<vmem>>, vector<16x1xf32>
      tpu.vector_store %arg8[%c0_30, %c0_31], %64 {strides = array<i32>} : memref<16x1xf32, #tpu.memory_space<vmem>>, vector<16x1xf32>,
      %c0_32 = arith.constant 0 : index
      %c0_33 = arith.constant 0 : index
      %66 = vector.load %arg9[%c0_32, %c0_33] : memref<16x1xf32, #tpu.memory_space<vmem>>, vector<16x1xf32>
      %cst_34 = arith.constant 0.000000e+00 : f32
      %67 = vector.broadcast %cst_34 : f32 to vector<16x128xf32>
      %68 = arith.select %54, %5, %67 : vector<16x128xi1>, vector<16x128xf32>
      %cst_35 = arith.constant dense<0.000000e+00> : vector<16xf32>
      %69 = vector.multi_reduction <add>, %68, %cst_35 [1] : vector<16x128xf32> to vector<16xf32>
      %70 = vector.shape_cast %69 : vector<16xf32> to vector<16x1xf32>
      %71 = arith.addf %66, %70 : vector<16x1xf32>
      %c0_36 = arith.constant 0 : index
      %c0_37 = arith.constant 0 : index
      %72 = vector.load %arg9[%c0_36, %c0_37] : memref<16x1xf32, #tpu.memory_space<vmem>>, vector<16x1xf32>
      tpu.vector_store %arg9[%c0_36, %c0_37], %71 {strides = array<i32>} : memref<16x1xf32, #tpu.memory_space<vmem>>, vector<16x1xf32>,
      %c0_38 = arith.constant 0 : index
      %c0_39 = arith.constant 0 : index
      %73 = vector.load %arg10[%c0_38, %c0_39] : memref<16x1xf32, #tpu.memory_space<vmem>>, vector<16x1xf32>
      %74 = arith.extui %54 : vector<16x128xi1> to vector<16x128xi32>
      %75 = arith.sitofp %74 : vector<16x128xi32> to vector<16x128xf32>
      %cst_40 = arith.constant dense<0.000000e+00> : vector<16xf32>
      %76 = vector.multi_reduction <add>, %75, %cst_40 [1] : vector<16x128xf32> to vector<16xf32>
      %77 = vector.shape_cast %76 : vector<16xf32> to vector<16x1xf32>
      %78 = arith.addf %73, %77 : vector<16x1xf32>
      %c0_41 = arith.constant 0 : index
      %c0_42 = arith.constant 0 : index
      %79 = vector.load %arg10[%c0_41, %c0_42] : memref<16x1xf32, #tpu.memory_space<vmem>>, vector<16x1xf32>
      tpu.vector_store %arg10[%c0_41, %c0_42], %78 {strides = array<i32>} : memref<16x1xf32, #tpu.memory_space<vmem>>, vector<16x1xf32>,
    } else {
    }
    %true = arith.constant true
    %30 = arith.xori %27, %true : i1
    %31 = arith.extui %30 : i1 to i32
    %c0_i32_20 = arith.constant 0 : i32
    %32 = arith.cmpi ne, %31, %c0_i32_20 : i32
    scf.if %32 {
      %36 = vector.broadcast %13 : vector<16x1xi32> to vector<16x128xi32>
      %37 = vector.broadcast %14 : vector<1x128xi32> to vector<16x128xi32>
      %38 = arith.cmpi eq, %36, %37 : vector<16x128xi32>
      %39 = vector.broadcast %9 : vector<16x1xf32> to vector<16x128xf32>
      %40 = arith.subf %5, %39 : vector<16x128xf32>
      %41 = math.exp %40 : vector<16x128xf32>
      %c0_23 = arith.constant 0 : index
      %c0_24 = arith.constant 0 : index
      %42 = vector.load %arg8[%c0_23, %c0_24] : memref<16x1xf32, #tpu.memory_space<vmem>>, vector<16x1xf32>
      %43 = arith.mulf %11, %42 : vector<16x1xf32>
      %cst_25 = arith.constant dense<0.000000e+00> : vector<16xf32>
      %44 = vector.multi_reduction <add>, %41, %cst_25 [1] : vector<16x128xf32> to vector<16xf32>
      %45 = vector.shape_cast %44 : vector<16xf32> to vector<16x1xf32>
      %46 = arith.addf %43, %45 : vector<16x1xf32>
      %c0_26 = arith.constant 0 : index
      %c0_27 = arith.constant 0 : index
      %47 = vector.load %arg8[%c0_26, %c0_27] : memref<16x1xf32, #tpu.memory_space<vmem>>, vector<16x1xf32>
      tpu.vector_store %arg8[%c0_26, %c0_27], %46 {strides = array<i32>} : memref<16x1xf32, #tpu.memory_space<vmem>>, vector<16x1xf32>,
      %c0_28 = arith.constant 0 : index
      %c0_29 = arith.constant 0 : index
      %48 = vector.load %arg9[%c0_28, %c0_29] : memref<16x1xf32, #tpu.memory_space<vmem>>, vector<16x1xf32>
      %cst_30 = arith.constant 0.000000e+00 : f32
      %49 = vector.broadcast %cst_30 : f32 to vector<16x128xf32>
      %50 = arith.select %38, %5, %49 : vector<16x128xi1>, vector<16x128xf32>
      %cst_31 = arith.constant dense<0.000000e+00> : vector<16xf32>
      %51 = vector.multi_reduction <add>, %50, %cst_31 [1] : vector<16x128xf32> to vector<16xf32>
      %52 = vector.shape_cast %51 : vector<16xf32> to vector<16x1xf32>
      %53 = arith.addf %48, %52 : vector<16x1xf32>
      %c0_32 = arith.constant 0 : index
      %c0_33 = arith.constant 0 : index
      %54 = vector.load %arg9[%c0_32, %c0_33] : memref<16x1xf32, #tpu.memory_space<vmem>>, vector<16x1xf32>
      tpu.vector_store %arg9[%c0_32, %c0_33], %53 {strides = array<i32>} : memref<16x1xf32, #tpu.memory_space<vmem>>, vector<16x1xf32>,
      %c0_34 = arith.constant 0 : index
      %c0_35 = arith.constant 0 : index
      %55 = vector.load %arg10[%c0_34, %c0_35] : memref<16x1xf32, #tpu.memory_space<vmem>>, vector<16x1xf32>
      %56 = arith.extui %38 : vector<16x128xi1> to vector<16x128xi32>
      %57 = arith.sitofp %56 : vector<16x128xi32> to vector<16x128xf32>
      %cst_36 = arith.constant dense<0.000000e+00> : vector<16xf32>
      %58 = vector.multi_reduction <add>, %57, %cst_36 [1] : vector<16x128xf32> to vector<16xf32>
      %59 = vector.shape_cast %58 : vector<16xf32> to vector<16x1xf32>
      %60 = arith.addf %55, %59 : vector<16x1xf32>
      %c0_37 = arith.constant 0 : index
      %c0_38 = arith.constant 0 : index
      %61 = vector.load %arg10[%c0_37, %c0_38] : memref<16x1xf32, #tpu.memory_space<vmem>>, vector<16x1xf32>
      tpu.vector_store %arg10[%c0_37, %c0_38], %60 {strides = array<i32>} : memref<16x1xf32, #tpu.memory_space<vmem>>, vector<16x1xf32>,
    } else {
    }
    %c0_i32_21 = arith.constant 0 : i32
    %33 = arith.cmpi eq, %arg1, %c0_i32_21 : i32
    %34 = arith.extui %33 : i1 to i32
    %c0_i32_22 = arith.constant 0 : i32
    %35 = arith.cmpi ne, %34, %c0_i32_22 : i32
    scf.if %35 {
      %c0_23 = arith.constant 0 : index
      %c0_24 = arith.constant 0 : index
      %36 = vector.load %arg10[%c0_23, %c0_24] : memref<16x1xf32, #tpu.memory_space<vmem>>, vector<16x1xf32>
      %c0_25 = arith.constant 0 : index
      %c0_26 = arith.constant 0 : index
      %37 = vector.load %arg9[%c0_25, %c0_26] : memref<16x1xf32, #tpu.memory_space<vmem>>, vector<16x1xf32>
      %c0_27 = arith.constant 0 : index
      %c0_28 = arith.constant 0 : index
      %38 = vector.load %arg7[%c0_27, %c0_28] : memref<16x1xf32, #tpu.memory_space<vmem>>, vector<16x1xf32>
      %c0_29 = arith.constant 0 : index
      %c0_30 = arith.constant 0 : index
      %39 = vector.load %arg8[%c0_29, %c0_30] : memref<16x1xf32, #tpu.memory_space<vmem>>, vector<16x1xf32>
      %40 = math.log %39 : vector<16x1xf32>
      %41 = arith.addf %38, %40 : vector<16x1xf32>
      %42 = arith.mulf %36, %41 : vector<16x1xf32>
      %43 = arith.subf %37, %42 : vector<16x1xf32>
      %cst_31 = arith.constant 9.99999996E-13 : f32
      %44 = vector.broadcast %cst_31 : f32 to vector<16x1xf32>
      %45 = arith.addf %36, %44 : vector<16x1xf32>
      %46 = tpu.reciprocal %45 {approx = true} : vector<16x1xf32> -> vector<16x1xf32>
      %47 = arith.mulf %43, %46 : vector<16x1xf32>
      %cst_32 = arith.constant -1.000000e+00 : f32
      %48 = vector.broadcast %cst_32 : f32 to vector<16x1xf32>
      %49 = arith.mulf %48, %47 : vector<16x1xf32>
      %c0_33 = arith.constant 0 : index
      %c0_34 = arith.constant 0 : index
      %50 = vector.load %arg6[%c0_33, %c0_34] : memref<16x1xf32, #tpu.memory_space<vmem>>, vector<16x1xf32>
      tpu.vector_store %arg6[%c0_33, %c0_34], %49 {strides = array<i32>} : memref<16x1xf32, #tpu.memory_space<vmem>>, vector<16x1xf32>,
    } else {
    }
    return
  }
  func.func @transform_0(%arg0: i32, %arg1: i32) -> (i32, i32) {
    %c0_i32 = arith.constant 0 : i32
    %c0_i32_0 = arith.constant 0 : i32
    return %arg0, %c0_i32 : i32, i32
  }
  func.func @transform_1(%arg0: i32, %arg1: i32) -> (i32, i32) {
    %c0_i32 = arith.constant 0 : i32
    %c0_i32_0 = arith.constant 0 : i32
    return %arg1, %c0_i32 : i32, i32
  }
  func.func @transform_2(%arg0: i32, %arg1: i32) -> (i32, i32) {
    %c0_i32 = arith.constant 0 : i32
    %c0_i32_0 = arith.constant 0 : i32
    return %arg0, %c0_i32 : i32, i32
  }
  func.func @transform_3(%arg0: i32, %arg1: i32) -> (i32, i32) {
    %c0_i32 = arith.constant 0 : i32
    %c0_i32_0 = arith.constant 0 : i32
    return %c0_i32, %arg1 : i32, i32
  }
  func.func @transform_4(%arg0: i32, %arg1: i32) -> (i32, i32) {
    %c0_i32 = arith.constant 0 : i32
    %c0_i32_0 = arith.constant 0 : i32
    return %arg0, %c0_i32 : i32, i32
  }
}

</mosaic_0001>

<bundles_post_ra>
// kernel: tpu_custom_call.1
= control target key start
LH: loop header
LB: loop body
LE: loop exit
PB: predicated region body
PF: predicated region fallthrough
CT: control target
= control target key end

     0   :  { %s915_s15 = smov 0   ;;  %s917_s16 = smov 0   ;;  %s1062_s0 = inlined_call_operand.vmem [shape: bf16[128,32], index: 0, kind: input, shape index: {}]   ;;  %s1063_s1 = inlined_call_operand.vmem [shape: bf16[128,32], index: 1, kind: input, shape index: {}]   ;;  %s1064_s2 = inlined_call_operand.vmem [shape: s32[128,1], index: 2, kind: input, shape index: {}]   ;;  %s1065_s3 = inlined_call_operand.vmem [shape: s32[1,128], index: 3, kind: input, shape index: {}]   ;;  %s1066_s4 = inlined_call_operand.vmem [shape: f32[128,1], index: 4, kind: output, shape index: {}]  }
   0x1   :  { %s919_s17 = smov 0  }
   0x2 LB: > { %s26_s18 = sadd.s32 1, %s880_s16  ;;  %p749_p0 = scmp.ge.s32.totalorder %s884_s17, 1  ;;  %s884_s17 = sphi %s919_s17, %s14_s17   ;;  %s880_s16 = sphi %s917_s16, %s1072_s16   ;;  %s876_s15 = sphi %s915_s15, %s1071_s15  }
   0x3   : > { %p28_p1 = scmp.ge.s32.totalorder %s26_s18, 8  ;;  %p205_p2 = scmp.lt.s32.totalorder %s884_s17, 9 }
   0x5   : > { %s1074_s18 = smov (%p28_p1, %s26_s18), 0  ;;  %p206_p3 = pnand %p749_p0, %p205_p2 }
   0x6   : > { %s750_s23 = sshll.u32 (!%p206_p3), %s876_s15, 1  ;;  %s766_s22 = sshll.u32 (!%p206_p3), %s876_s15, 4 }
   0x7   : > { %209 = sbr.rel (%p206_p3) target bundleno = 732 (0x2dc), region = 36  ;;  %p245_p4 = scmp.lt.s32.totalorder (!%p206_p3), %s750_s23, 15 }
   0xc   : > { %v837_v0 = vld [vmem:[%s1063_s1 + $0x38] sm:$0xff]   ;;  %v886_v1 = vmov 0.0   ;;  %vm348_vm0 = vcmask 261120   ;;  %v838_v3 = vld [vmem:[%s1063_s1 + $0x30] sm:$0xff]   ;;  %vm887_vm1 = vmmov 0   ;;  %s1076_s23 = smov (!%p245_p4, %s750_s23), 15  ;;  %v452_v30 = vlaneseq }
   0xd   : > { %787 = vmatprep.subr.bf16.mxu0 %v886_v1  ;;  %v374_v2 = vsel %vm348_vm0, %v837_v0, 0  ;;  %v371_v4 = vsel %vm348_vm0, %v838_v3, 0  ;;  %803 = vmatprep.mubr.msk.bf16.mxu0 %vm887_vm1, %v886_v1  ;;  %v839_v5 = vld [vmem:[%s1063_s1 + $0x28] sm:$0xff]   ;;  %s751_s26 = sshll.u32 %s1076_s23, 2  ;;  %v840_v7 = vld [vmem:[%s1063_s1 + $0x20] sm:$0xff]   ;;  %v841_v9 = vld [vmem:[%s1063_s1 + $0x18] sm:$0xff]   ;;  %v455_v36 = vstv %s766_s22 }
   0xe   : > { %788 = vmatpush3.bf16.xpose.msra.mxu0 %v374_v2  ;;  %s248_s29 = scalar_lea.vmem %s1062_s0, %s751_s26  ;;  %v368_v6 = vsel %vm348_vm0, %v839_v5, 0  ;;  %v365_v8 = vsel %vm348_vm0, %v840_v7, 0  ;;  %v362_v10 = vsel %vm348_vm0, %v841_v9, 0  ;;  %v842_v11 = vld [vmem:[%s1063_s1 + $0x10] sm:$0xff]   ;;  %v843_v13 = vld [vmem:[%s1063_s1 + $0x8] sm:$0xff]   ;;  %v844_v15 = vld [vmem:[%s1063_s1] sm:$0xff]  }
   0xf   : > { %789 = vmatprep.subr.bf16.mxu0 %v886_v1  ;;  %v359_v12 = vsel %vm348_vm0, %v842_v11, 0  ;;  %v356_v14 = vsel %vm348_vm0, %v843_v13, 0  ;;  %v353_v16 = vsel %vm348_vm0, %v844_v15, 0  ;;  %v845_v17 = vld [vmem:[%s248_s29] sm:$0xff]   ;;  %v888_v18 = vmov 0   ;;  %s753_s14 = sshll.u32 %s1076_s23, 3 }
  0x10   : > { %836 = vset.pattern.permute.xlu0 %v888_v18  ;;  %835 = vset.pattern.permute.xlu1 %v888_v18  ;;  %vm276_vm2 = vcmask 7168   ;;  %v889_v19 = vmov -1e+30   ;;  %s260_s21 = scalar_lea.vmem %s1064_s2, %s753_s14  ;;  %v453_v34 = vshrl.u32 %v452_v30, 7  ;;  %v459_v38 = vand.u32 127, %v452_v30  ;;  %s269_s27 = scalar_lea.vmem %s1066_s4, %s753_s14 }
  0x11   : > { %277 = vst.msk [vmem:[#allocation2] sm:$0xff] %vm276_vm2, %v889_v19  ;;  %278 = vst.msk [vmem:[#allocation2 + $0x8] sm:$0xff] %vm276_vm2, %v889_v19  ;;  %v434_v24 = vld [vmem:[%s260_s21] sm:$0xff]  ;;  %v435_v35 = vld [vmem:[%s260_s21 + $0x8] sm:$0xff] }
  0x12   : > { %279 = vst.msk [vmem:[#allocation3] sm:$0xff] %vm276_vm2, %v886_v1  ;;  %280 = vst.msk [vmem:[#allocation3 + $0x8] sm:$0xff] %vm276_vm2, %v886_v1  ;;  %v456_v37 = vadd.s32 %v455_v36, %v453_v34  ;;  %v777_v39 = vld [vmem:[%s1065_s3] ss:$0 sm:$0xff]  ;;  %vm464_vm4 = vcmp.lt.s32.totalorder %v459_v38, 16  ;;  %v454_v50 = vadd.s32 8, %v453_v34 }
  0x13   : > { %281 = vst.msk [vmem:[#allocation4] sm:$0xff] %vm276_vm2, %v886_v1  ;;  %282 = vst.msk [vmem:[#allocation4 + $0x8] sm:$0xff] %vm276_vm2, %v886_v1 }
  0x14   : > { %283 = vst.msk [vmem:[#allocation5] sm:$0xff] %vm276_vm2, %v886_v1  ;;  %284 = vst.msk [vmem:[#allocation5 + $0x8] sm:$0xff] %vm276_vm2, %v886_v1  ;;  %vm462_vm3 = vcmp.ne.s32.totalorder %v456_v37, %v459_v38  ;;  %v457_v51 = vadd.s32 %v455_v36, %v454_v50 }
  0x15   : > { %vm1017_vm6 = vmand %vm462_vm3, %vm464_vm4 }
  0x16   : > { %790 = vmatpush3.bf16.xpose.msra.mxu0 %v371_v4  ;;  %vm463_vm8 = vcmp.ne.s32.totalorder %v457_v51, %v459_v38 }
  0x17   : > { %791 = vmatprep.subr.bf16.mxu0 %v886_v1  ;;  %vm468_vm10 = vmand %vm463_vm8, %vm464_vm4 }
  0x18   : > { %v417_v25 = vld [vmem:[#allocation2] sm:$0xff]  ;;  %v418_v28 = vld [vmem:[#allocation2 + $0x8] sm:$0xff] }
  0x1b   : > { %v525_v60 = vld [vmem:[#allocation5] sm:$0xff]  ;;  %v526_v11 = vld [vmem:[#allocation5 + $0x8] sm:$0xff] }
  0x1e   : > { %792 = vmatpush3.bf16.xpose.msra.mxu0 %v368_v6  ;;  %v502_v6 = vld [vmem:[#allocation3 + $0x8] sm:$0xff] }
  0x1f   : > { %793 = vmatprep.subr.bf16.mxu0 %v886_v1 }
  0x26   : > { %794 = vmatpush3.bf16.xpose.msra.mxu0 %v365_v8 }
  0x27   : > { %795 = vmatprep.subr.bf16.mxu0 %v886_v1 }
  0x2e   : > { %796 = vmatpush3.bf16.xpose.msra.mxu0 %v362_v10 }
  0x2f   : > { %797 = vmatprep.subr.bf16.mxu0 %v886_v1 }
  0x36   : > { %798 = vmatpush3.bf16.xpose.msra.mxu0 %v359_v12 }
  0x37   : > { %799 = vmatprep.subr.bf16.mxu0 %v886_v1 }
  0x3e   : > { %800 = vmatpush3.bf16.xpose.msra.mxu0 %v356_v14 }
  0x3f   : > { %801 = vmatprep.subr.bf16.mxu0 %v886_v1 }
  0x46   : > { %802 = vmatpush3.bf16.xpose.msra.mxu0 %v353_v16  ;;  %v513_v16 = vld [vmem:[#allocation4] sm:$0xff] }
  0x4d   : > { %804 = vmatmul.mubr.msk.bf16.vlgmr.msra.gmra.mxu0 %vm348_vm0, %v845_v17 }
 0x10d   : > { %v998_v20 = vpop.f32.mrf.mxu0 }
 0x10e   : > { %419 = vmax.xlane.f32.xlu0 %v998_v20 }
 0x10f   : > { %v805_v21 = vpop.f32.mrf.mxu0 }
 0x110   : > { %v514_v21 = vld [vmem:[#allocation4 + $0x8] sm:$0xff] }
 0x111   : > { %v1001_v22 = vpop.f32.mrf.mxu0 }
 0x112   : > { %421 = vmax.xlane.f32.xlu0 %v1001_v22 }
 0x113   : > { %v806_v23 = vpop.f32.mrf.mxu0 }
 0x128   : > { %470 = vperm.xlu0 %836, %v434_v24  }
 0x197   : > { %v420_v26 = vpop.xlane.xlu0 %419 }
 0x198   : > { %v423_v27 = vmax.f32 %v417_v25, %v420_v26 }
 0x19a   : > { %v425_v29 = vsub.f32 %v417_v25, %v423_v27  ;;  %432 = vst.msk [vmem:[#allocation2] sm:$0xff] %vm276_vm2, %v423_v27  ;;  %485 = vperm.xlu1 %835, %v423_v27  }
 0x19b   : > { %v422_v31 = vpop.xlane.xlu0 %421 }
 0x19c   : > { %v424_v32 = vmax.f32 %v418_v28, %v422_v31  ;;  %v427_v63 = vmul.f32 1.442695, %v425_v29 }
 0x19e   : > { %v426_v33 = vsub.f32 %v418_v28, %v424_v32  ;;  %433 = vst.msk [vmem:[#allocation2 + $0x8] sm:$0xff] %vm276_vm2, %v424_v32  ;;  %490 = vperm.xlu1 %835, %v424_v32  }
 0x1a0   : > { %v429_v0 = vmul.f32 1.442695, %v426_v33 }
 0x1a1   : > { %v615_v28 = vld [vmem:[#allocation2] sm:$0xff] }
 0x1a2   : > { %473 = vperm.xlu1 %835, %v435_v35  }
 0x1a3   : > { %v471_v40 = vpop.permute.xlu0 %470 }
 0x1a4   : > { %vm479_vm5 = vcmp.eq.s32.totalorder %v471_v40, %v777_v39 }
 0x1a5   : > { %vm1023_vm7 = vmand %vm479_vm5, %vm1017_vm6  ;;  %v616_v34 = vld [vmem:[#allocation2 + $0x8] sm:$0xff] }
 0x1a6   : > { %v769_v43 = vsel %vm1023_vm7, 1.0, %v886_v1  ;;  %v515_v58 = vsel %vm1023_vm7, %v998_v20, 0.0 }
 0x1a7   : > { %531 = vadd.xlane.f32.xlu0 %v769_v43 }
 0x215   : > { %v486_v44 = vpop.permute.xlu1 %485 }
 0x216   : > { %v493_v45 = vsub.f32 %v998_v20, %v486_v44 }
 0x218   : > { %v495_v46 = vmul.f32 1.442695, %v493_v45 }
 0x219   : > { %v491_v47 = vpop.permute.xlu1 %490 }
 0x21a   : > { %846 = vpow2.f32 %v495_v46  ;;  %v494_v48 = vsub.f32 %v1001_v22, %v491_v47 }
 0x21c   : > { %v497_v49 = vmul.f32 1.442695, %v494_v48 }
 0x21d   : > { %v474_v53 = vpop.permute.xlu1 %473 }
 0x21e   : > { %848 = vpow2.f32 %v497_v49  ;;  %vm480_vm9 = vcmp.eq.s32.totalorder %v474_v53, %v777_v39 }
 0x21f   : > { %vm482_vm11 = vmand %vm480_vm9, %vm468_vm10  ;;  %850 = vpow2.f32 %v427_v63 }
 0x220   : > { %v770_v57 = vsel %vm482_vm11, 1.0, %v886_v1  ;;  %v516_v59 = vsel %vm482_vm11, %v1001_v22, 0.0  ;;  %852 = vpow2.f32 %v429_v0  ;;  %v501_v1 = vld [vmem:[#allocation3] sm:$0xff] }
 0x227   : > { %v847_v52 = vpop.eup %846 }
 0x228   : > { %v499_v54 = vsel %vm1017_vm6, %v847_v52, 0.0 }
 0x229   : > { %505 = vadd.xlane.f32.xlu1 %v499_v54 }
 0x22b   : > { %v849_v55 = vpop.eup %848 }
 0x22c   : > { %v500_v56 = vsel %vm468_vm10, %v849_v55, 0.0  ;;  %v851_v2 = vpop.eup %850 }
 0x22d   : > { %507 = vadd.xlane.f32.xlu1 %v500_v56  ;;  %v503_v3 = vmul.f32 %v851_v2, %v501_v1  ;;  %v853_v4 = vpop.eup %852 }
 0x22e   : > { %v504_v8 = vmul.f32 %v853_v4, %v502_v6 }
 0x230   : > { %v532_v61 = vpop.xlane.xlu0 %531 }
 0x231   : > { %533 = vadd.xlane.f32.xlu1 %v770_v57  ;;  %v535_v62 = vadd.f32 %v532_v61, %v525_v60 }
 0x233   : > { %537 = vst.msk [vmem:[#allocation5] sm:$0xff] %vm276_vm2, %v535_v62 }
 0x235   : > { %517 = vadd.xlane.f32.xlu1 %v515_v58 }
 0x239   : > { %519 = vadd.xlane.f32.xlu1 %v516_v59 }
 0x23a   : > { %v611_v15 = vld [vmem:[#allocation5] sm:$0xff] }
 0x23b   : > { %v629_v18 = vadd.f32 1e-12, %v611_v15 }
 0x2b2   : > { %v506_v5 = vpop.xlane.xlu1 %505 }
 0x2b3   : > { %v509_v7 = vadd.f32 %v506_v5, %v503_v3 }
 0x2b5   : > { %511 = vst.msk [vmem:[#allocation3] sm:$0xff] %vm276_vm2, %v509_v7 }
 0x2b6   : > { %v508_v9 = vpop.xlane.xlu1 %507 }
 0x2b7   : > { %v510_v10 = vadd.f32 %v508_v9, %v504_v8 }
 0x2b9   : > { %512 = vst.msk [vmem:[#allocation3 + $0x8] sm:$0xff] %vm276_vm2, %v510_v10 }
 0x2ba   : > { %v534_v12 = vpop.xlane.xlu1 %533 }
 0x2bb   : > { %v536_v13 = vadd.f32 %v534_v12, %v526_v11 }
 0x2bc   : > { %v617_v14 = vld [vmem:[#allocation3] sm:$0xff] }
 0x2bd   : > { %854 = vlog2.f32 %v617_v14  ;;  %538 = vst.msk [vmem:[#allocation5 + $0x8] sm:$0xff] %vm276_vm2, %v536_v13 }
 0x2be   : > { %v518_v17 = vpop.xlane.xlu1 %517 }
 0x2bf   : > { %v521_v19 = vadd.f32 %v518_v17, %v513_v16 }
 0x2c0   : > { %v618_v20 = vld [vmem:[#allocation3 + $0x8] sm:$0xff] }
 0x2c1   : > { %856 = vlog2.f32 %v618_v20  ;;  %523 = vst.msk [vmem:[#allocation4] sm:$0xff] %vm276_vm2, %v521_v19 }
 0x2c2   : > { %v520_v22 = vpop.xlane.xlu1 %519  ;;  %858 = vrcp.f32 %v629_v18 }
 0x2c3   : > { %v522_v23 = vadd.f32 %v520_v22, %v514_v21 }
 0x2c4   : > { %v612_v24 = vld [vmem:[#allocation5 + $0x8] sm:$0xff] }
 0x2c5   : > { %v630_v25 = vadd.f32 1e-12, %v612_v24  ;;  %524 = vst.msk [vmem:[#allocation4 + $0x8] sm:$0xff] %vm276_vm2, %v522_v23 }
 0x2c7   : > { %860 = vrcp.f32 %v630_v25 }
 0x2c8   : > { %v613_v35 = vld [vmem:[#allocation4] sm:$0xff] }
 0x2ca   : > { %v855_v26 = vpop.eup %854 }
 0x2cb   : > { %v620_v27 = vmul.f32 0.6931472, %v855_v26 }
 0x2cc   : > { %v614_v40 = vld [vmem:[#allocation4 + $0x8] sm:$0xff] }
 0x2cd   : > { %v623_v29 = vadd.f32 %v620_v27, %v615_v28 }
 0x2ce   : > { %v857_v30 = vpop.eup %856 }
 0x2cf   : > { %v625_v31 = vmul.f32 %v623_v29, %v611_v15  ;;  %v622_v32 = vmul.f32 0.6931472, %v857_v30  ;;  %v859_v33 = vpop.eup %858 }
 0x2d1   : > { %v624_v36 = vadd.f32 %v622_v32, %v616_v34  ;;  %v627_v37 = vsub.f32 %v613_v35, %v625_v31 }
 0x2d3   : > { %v626_v38 = vmul.f32 %v624_v36, %v612_v24  ;;  %v633_v39 = vmul.f32 %v859_v33, %v627_v37 }
 0x2d4   : > { %v861_v43 = vpop.eup %860 }
 0x2d5   : > { %v635_v41 = vmul.f32 -1.0, %v633_v39  ;;  %v628_v42 = vsub.f32 %v614_v40, %v626_v38 }
 0x2d7   : > { %637 = vst.msk [vmem:[%s269_s27] sm:$0xff] %vm276_vm2, %v635_v41  ;;  %v634_v44 = vmul.f32 %v861_v43, %v628_v42 }
 0x2d9   : > { %v636_v45 = vmul.f32 -1.0, %v634_v44 }
 0x2db   : > { %638 = vst.msk [vmem:[%s269_s27 + $0x8] sm:$0xff] %vm276_vm2, %v636_v45 }
 0x2dc PF: > { %s14_s17 = sadd.s32 1, %s884_s17   ;;  %s1071_s15 = smov %s880_s16 }
 0x2dd   : > { %p11_p5 = scmp.ge.s32.totalorder %s14_s17, 10   ;;  %s1072_s16 = smov %s1074_s18 }
 0x2df   :  { %13 = sbr.rel (!%p11_p5) target bundleno = 2 (0x2), region = 91 }

</bundles_post_ra>
